<compile_context>
chip_gen: v5e
topology: v5e:2x2
jax: 0.10.0
libtpu: 0.0.40
codegen_flags: <defaults>
</compile_context>

<pallas_src>
import functools
import math

import numpy as np

import jax
import jax.numpy as jnp
from jax.experimental import pallas as pl
from jax.experimental.pallas import tpu as pltpu

LANES = 128
NUM_CORES = 2                       # leading "parallel" grid axis (v7x megacore)
_VMEM_BUDGET = 40 * 2**20           # shrink tiles if input buffers exceed this
_SUBLANE_QUANTUM = {4: 8, 2: 16, 1: 32}   # f32 -> 8 rows, bf16 -> 16, int8/fp8 -> 32


def _round_up(x: int, m: int) -> int:
    return ((x + m - 1) // m) * m


# --------------------------------------------------------------------------
# Kernel: grid = (core, tile-within-core).  A scalar-prefetched schedule maps
# each step to its weight id; the active weight's (1,1,1,128) output block is
# the accumulator (init on the weight's first tile on this core, += each tile,
# lane-reduce on its last tile).
# --------------------------------------------------------------------------
def _pnorm_kernel(tw_ref, *refs, p, num_w, tiles_per_core):
    x_refs = refs[:num_w]
    o_ref = refs[num_w]

    c = pl.program_id(0)
    j = pl.program_id(1)
    step = c * tiles_per_core + j
    n_steps = tw_ref.shape[0]

    w = tw_ref[step]                                   # -1 => padded dummy step
    prev_w = tw_ref[jnp.maximum(step - 1, 0)]
    next_w = tw_ref[jnp.minimum(step + 1, n_steps - 1)]
    real = w >= 0
    is_first = jnp.logical_and(real, jnp.logical_or(j == 0, prev_w != w))
    is_last = jnp.logical_and(
        real, jnp.logical_or(j == tiles_per_core - 1, next_w != w))

    @pl.when(is_first)
    def _():
        o_ref[...] = jnp.zeros_like(o_ref)

    # One branch per weight (traced once); only the active branch executes.
    for k in range(num_w):
        @pl.when(w == k)
        def _(k=k):
            x = x_refs[k][...].astype(jnp.float32)
            if p == 2:
                v = x * x
            elif p == 1:
                v = jnp.abs(x)
            elif p == 0:
                # torch.norm(p=0) counts non-zeros; zero padding contributes 0.
                v = (x != 0).astype(jnp.float32)
            else:
                v = jnp.abs(x) ** p
            # Reduce only the row axis per step (VALU adds, hidden under DMA).
            o_ref[...] += jnp.sum(v, axis=0).reshape(1, 1, 1, LANES)

    @pl.when(is_last)
    def _():
        # Fold the cross-lane (XLU) reduce into the weight's last tile.
        tot = jnp.sum(o_ref[...], axis=-1, keepdims=True)
        o_ref[...] = jnp.broadcast_to(tot, o_ref.shape)


# --------------------------------------------------------------------------
# Static per-weight tiling plan (pure Python, runs at trace time).
# --------------------------------------------------------------------------
def _plan(arrays, tile_rows):
    plans = []
    for w in arrays:
        numel = int(math.prod(w.shape))
        dt = jnp.dtype(w.dtype)
        q = _SUBLANE_QUANTUM.get(dt.itemsize, 8)
        rows = max(1, -(-numel // LANES))
        eff = _round_up(max(tile_rows, q), q)
        nblk = max(1, -(-rows // eff))
        br = _round_up(-(-rows // nblk), q)
        plans.append(dict(numel=numel, rows_pad=br * nblk, br=br, nblk=nblk,
                          dtype=dt))
    return plans


def _vmem_bytes(plans):
    b = 0
    for pln in plans:
        b += 2 * pln["br"] * LANES * pln["dtype"].itemsize   # double-buffered
    b += 2 * NUM_CORES * LANES * 4                           # output block
    return b


def _fused_sum_abs_pow(arrays, p, tile_rows):
    """ONE pallas_call; returns f32[num_weights] with sum(|w_k|^p) per weight."""
    num_w = len(arrays)

    plans = _plan(arrays, tile_rows)
    tr = tile_rows
    while _vmem_bytes(plans) > _VMEM_BUDGET and tr > 512:
        tr //= 2
        plans = _plan(arrays, tr)

    # Lane-dense (rows, 128) views at native dtype; zero-pad only when needed
    # (zeros contribute nothing to sum|x|^p for any p, including p=0).
    xs = []
    for w, pln in zip(arrays, plans):
        flat = jnp.ravel(w)
        padded = pln["rows_pad"] * LANES
        if padded != pln["numel"]:
            flat = jnp.pad(flat, (0, padded - pln["numel"]))
        xs.append(flat.reshape(pln["rows_pad"], LANES))

    # Static tile schedule: weight id per global step, split across NUM_CORES.
    ntiles = [pln["nblk"] for pln in plans]
    starts, acc = [], 0
    for nt in ntiles:
        starts.append(acc)
        acc += nt
    total = acc
    tiles_per_core = -(-total // NUM_CORES)
    n_steps = NUM_CORES * tiles_per_core

    tw_np = np.full((n_steps,), -1, dtype=np.int32)        # -1 = dummy pad step
    pos = 0
    for k, nt in enumerate(ntiles):
        tw_np[pos:pos + nt] = k
        pos += nt
    tw = jnp.asarray(tw_np)

    # Which (core, weight) output blocks are actually produced; everything else
    # is never written (uninitialized HBM) and gets masked out below.
    valid_np = np.zeros((NUM_CORES, num_w), dtype=bool)
    for k, (s, nt) in enumerate(zip(starts, ntiles)):
        for c in range(NUM_CORES):
            lo, hi = c * tiles_per_core, (c + 1) * tiles_per_core
            if max(s, lo) < min(s + nt, hi):
                valid_np[c, k] = True
    valid = jnp.asarray(valid_np)

    # Per-weight BlockSpecs.  When a weight is inactive its block index simply
    # holds its previous value (clip), so no redundant re-DMA is issued.
    in_specs = []
    for pln, s in zip(plans, starts):
        def idx(c, j, tw_ref, _s=s, _n=pln["nblk"], _tpc=tiles_per_core):
            step = c * _tpc + j
            return (jnp.clip(step - _s, 0, _n - 1), 0)
        in_specs.append(pl.BlockSpec((pln["br"], LANES), idx))

    def out_idx(c, j, tw_ref, _tpc=tiles_per_core, _nw=num_w):
        step = c * _tpc + j
        return (c, jnp.clip(tw_ref[step], 0, _nw - 1), 0, 0)

    out_spec = pl.BlockSpec((1, 1, 1, LANES), out_idx)

    kern = functools.partial(_pnorm_kernel, p=p, num_w=num_w,
                             tiles_per_core=tiles_per_core)

    vmem_limit = int(min(64 * 2**20, max(32 * 2**20, 2 * _vmem_bytes(plans))))

    out = pl.pallas_call(
        kern,
        out_shape=jax.ShapeDtypeStruct((NUM_CORES, num_w, 1, LANES), jnp.float32),
        grid_spec=pltpu.PrefetchScalarGridSpec(
            num_scalar_prefetch=1,
            grid=(NUM_CORES, tiles_per_core),
            in_specs=in_specs,
            out_specs=out_spec,
        ),
        compiler_params=pltpu.CompilerParams(
            dimension_semantics=("parallel", "arbitrary"),
            vmem_limit_bytes=vmem_limit,
        ),
    )(tw, *xs)

    # Lane 0 of every written block already holds its lane-reduced partial sum.
    per_core = jnp.where(valid, out[:, :, 0, 0], 0.0)
    return jnp.sum(per_core, axis=0)


@functools.partial(jax.jit, static_argnames=("p", "tile_rows"))
def _reg_loss_jit(arrays, weight_decay, p, tile_rows):
    sums = _fused_sum_abs_pow(arrays, p, tile_rows)       # sum |w|^p per weight
    if p == 0 or p == 1:
        norms = sums
    elif p == 2:
        norms = jnp.sqrt(sums)
    else:
        norms = sums ** (1.0 / p)
    return (jnp.asarray(weight_decay, jnp.float32) * jnp.sum(norms)).astype(jnp.float32)


def regularization_loss(weights, weight_decay, p=2, tile_rows=4096):
    """reg_loss = weight_decay * sum_k ||w_k||_p  (flattened vector p-norm).

    `weights` is a list of (name, array) pairs, i.e. the 'weight'-filtered
    output of model.named_parameters().
    """
    if weight_decay <= 0:
        raise ValueError("param weight_decay can not be <=0")
    if isinstance(p, float) and float(p).is_integer():
        p = int(p)   # keep integer powers on the VALU (avoid exp/log on the EUP)
    arrays = tuple(w for _, w in weights)
    if not arrays:
        return jnp.float32(0.0)
    return _reg_loss_jit(arrays, jnp.float32(weight_decay), p=p,
                         tile_rows=int(tile_rows))


if __name__ == "__main__":
    # Synthetic "model" parameters (deterministic init) mimicking
    # model.named_parameters() filtered for 'weight'.  Mixed dtypes on purpose:
    # weights stay at native width all the way to the kernel.
    key = jax.random.PRNGKey(0)
    k1, k2, k3, k4 = jax.random.split(key, 4)
    weights = [
        ("conv1.weight", jax.random.normal(k1, (4, 4, 3, 3), jnp.float32) * 0.1),
        ("fc1.weight", jax.random.normal(k2, (64, 64), jnp.float32) * 0.1),
        ("fc2.weight",
         (jax.random.normal(k3, (64, 32), jnp.float32) * 0.1).astype(jnp.bfloat16)),
        ("fc3.weight", jax.random.normal(k4, (8, 32), jnp.float32) * 0.1),
    ]
    print("---------------regularization weight---------------")
    for name, _ in weights:
        print(name)
    print("---------------------------------------------------")

    weight_decay = 0.01
    p = 2

    # Plain-JAX reference (each weight cast to f32, matching the kernel's
    # in-kernel accumulation dtype).
    ref = jnp.float32(weight_decay) * sum(
        jnp.linalg.norm(jnp.ravel(w).astype(jnp.float32), ord=p) for _, w in weights)

    # 1) default tiling: every demo weight fits in a single block.
    loss = jax.block_until_ready(regularization_loss(weights, weight_decay, p))
    assert jnp.allclose(loss, ref, rtol=1e-4, atol=1e-6), (loss, ref)

    # 2) artificially small tiles: exercises multi-tile accumulation, a weight
    #    whose tiles are split across the two-core grid axis, and the padded
    #    dummy schedule step.
    loss_small = jax.block_until_ready(
        regularization_loss(weights, weight_decay, p, tile_rows=8))
    assert jnp.allclose(loss_small, ref, rtol=1e-4, atol=1e-6), (loss_small, ref)

    print("KERNEL_OK")
</pallas_src>

<mosaic_0001>
module attributes {stable_mosaic.version = 11 : i64} {
  func.func @_pnorm_kernel(%arg0: i32, %arg1: i32, %arg2: memref<4xi32, #tpu.memory_space<smem>>, %arg3: memref<8x128xf32, #tpu.memory_space<vmem>>, %arg4: memref<32x128xf32, #tpu.memory_space<vmem>>, %arg5: memref<16x128xbf16, #tpu.memory_space<vmem>>, %arg6: memref<8x128xf32, #tpu.memory_space<vmem>>, %arg7: memref<1x1x1x128xf32, #tpu.memory_space<vmem>>) attributes {dimension_semantics = [#tpu.dimension_semantics<parallel>, #tpu.dimension_semantics<arbitrary>], iteration_bounds = array<i64: 2, 2>, scalar_prefetch = 1 : i64, scratch_operands = 0 : i64, tpu.core_type = #tpu.core_type<tc>, window_params = [{transform_indices = @transform_0, window_bounds = array<i64: 8, 128>}, {transform_indices = @transform_1, window_bounds = array<i64: 32, 128>}, {transform_indices = @transform_2, window_bounds = array<i64: 16, 128>}, {transform_indices = @transform_3, window_bounds = array<i64: 8, 128>}, {transform_indices = @transform_4, window_bounds = array<i64: 1, 1, 1, 128>}]} {
    %c2_i32 = arith.constant 2 : i32
    %0 = arith.muli %arg0, %c2_i32 : i32
    %1 = arith.addi %0, %arg1 : i32
    %2 = arith.index_cast %1 : i32 to index
    %3 = memref.load %arg2[%2] : memref<4xi32, #tpu.memory_space<smem>>
    %c1_i32 = arith.constant 1 : i32
    %4 = arith.subi %1, %c1_i32 : i32
    %c0_i32 = arith.constant 0 : i32
    %5 = arith.maxsi %4, %c0_i32 : i32
    %6 = arith.index_cast %5 : i32 to index
    %7 = memref.load %arg2[%6] : memref<4xi32, #tpu.memory_space<smem>>
    %c1_i32_0 = arith.constant 1 : i32
    %8 = arith.addi %1, %c1_i32_0 : i32
    %c3_i32 = arith.constant 3 : i32
    %9 = arith.minsi %8, %c3_i32 : i32
    %10 = arith.index_cast %9 : i32 to index
    %11 = memref.load %arg2[%10] : memref<4xi32, #tpu.memory_space<smem>>
    %c0_i32_1 = arith.constant 0 : i32
    %12 = arith.cmpi sge, %3, %c0_i32_1 : i32
    %c0_i32_2 = arith.constant 0 : i32
    %13 = arith.cmpi eq, %arg1, %c0_i32_2 : i32
    %14 = arith.cmpi ne, %7, %3 : i32
    %15 = arith.ori %13, %14 : i1
    %16 = arith.andi %12, %15 : i1
    %c1_i32_3 = arith.constant 1 : i32
    %17 = arith.cmpi eq, %arg1, %c1_i32_3 : i32
    %18 = arith.cmpi ne, %11, %3 : i32
    %19 = arith.ori %17, %18 : i1
    %20 = arith.andi %12, %19 : i1
    %21 = arith.extui %16 : i1 to i32
    %c0_i32_4 = arith.constant 0 : i32
    %22 = arith.cmpi ne, %21, %c0_i32_4 : i32
    scf.if %22 {
      %cst = arith.constant 0.000000e+00 : f32
      %37 = vector.broadcast %cst : f32 to vector<1x1x1x128xf32>
      %c0 = arith.constant 0 : index
      %c0_14 = arith.constant 0 : index
      %c0_15 = arith.constant 0 : index
      %c0_16 = arith.constant 0 : index
      %38 = vector.load %arg7[%c0, %c0_14, %c0_15, %c0_16] : memref<1x1x1x128xf32, #tpu.memory_space<vmem>>, vector<1x1x1x128xf32>
      tpu.vector_store %arg7[%c0, %c0_14, %c0_15, %c0_16], %37 {strides = array<i32>} : memref<1x1x1x128xf32, #tpu.memory_space<vmem>>, vector<1x1x1x128xf32>,
    } else {
    }
    %c0_i32_5 = arith.constant 0 : i32
    %23 = arith.cmpi eq, %3, %c0_i32_5 : i32
    %24 = arith.extui %23 : i1 to i32
    %c0_i32_6 = arith.constant 0 : i32
    %25 = arith.cmpi ne, %24, %c0_i32_6 : i32
    scf.if %25 {
      %c0 = arith.constant 0 : index
      %c0_14 = arith.constant 0 : index
      %37 = vector.load %arg3[%c0, %c0_14] : memref<8x128xf32, #tpu.memory_space<vmem>>, vector<8x128xf32>
      %38 = arith.mulf %37, %37 : vector<8x128xf32>
      %c0_15 = arith.constant 0 : index
      %c0_16 = arith.constant 0 : index
      %c0_17 = arith.constant 0 : index
      %c0_18 = arith.constant 0 : index
      %39 = vector.load %arg7[%c0_15, %c0_16, %c0_17, %c0_18] : memref<1x1x1x128xf32, #tpu.memory_space<vmem>>, vector<1x1x1x128xf32>
      %cst = arith.constant dense<0.000000e+00> : vector<128xf32>
      %40 = vector.multi_reduction <add>, %38, %cst [0] : vector<8x128xf32> to vector<128xf32>
      %41 = vector.shape_cast %40 : vector<128xf32> to vector<1x1x1x128xf32>
      %42 = arith.addf %39, %41 : vector<1x1x1x128xf32>
      %c0_19 = arith.constant 0 : index
      %c0_20 = arith.constant 0 : index
      %c0_21 = arith.constant 0 : index
      %c0_22 = arith.constant 0 : index
      %43 = vector.load %arg7[%c0_19, %c0_20, %c0_21, %c0_22] : memref<1x1x1x128xf32, #tpu.memory_space<vmem>>, vector<1x1x1x128xf32>
      tpu.vector_store %arg7[%c0_19, %c0_20, %c0_21, %c0_22], %42 {strides = array<i32>} : memref<1x1x1x128xf32, #tpu.memory_space<vmem>>, vector<1x1x1x128xf32>,
    } else {
    }
    %c1_i32_7 = arith.constant 1 : i32
    %26 = arith.cmpi eq, %3, %c1_i32_7 : i32
    %27 = arith.extui %26 : i1 to i32
    %c0_i32_8 = arith.constant 0 : i32
    %28 = arith.cmpi ne, %27, %c0_i32_8 : i32
    scf.if %28 {
      %c0 = arith.constant 0 : index
      %c0_14 = arith.constant 0 : index
      %37 = vector.load %arg4[%c0, %c0_14] : memref<32x128xf32, #tpu.memory_space<vmem>>, vector<32x128xf32>
      %38 = arith.mulf %37, %37 : vector<32x128xf32>
      %c0_15 = arith.constant 0 : index
      %c0_16 = arith.constant 0 : index
      %c0_17 = arith.constant 0 : index
      %c0_18 = arith.constant 0 : index
      %39 = vector.load %arg7[%c0_15, %c0_16, %c0_17, %c0_18] : memref<1x1x1x128xf32, #tpu.memory_space<vmem>>, vector<1x1x1x128xf32>
      %cst = arith.constant dense<0.000000e+00> : vector<128xf32>
      %40 = vector.multi_reduction <add>, %38, %cst [0] : vector<32x128xf32> to vector<128xf32>
      %41 = vector.shape_cast %40 : vector<128xf32> to vector<1x1x1x128xf32>
      %42 = arith.addf %39, %41 : vector<1x1x1x128xf32>
      %c0_19 = arith.constant 0 : index
      %c0_20 = arith.constant 0 : index
      %c0_21 = arith.constant 0 : index
      %c0_22 = arith.constant 0 : index
      %43 = vector.load %arg7[%c0_19, %c0_20, %c0_21, %c0_22] : memref<1x1x1x128xf32, #tpu.memory_space<vmem>>, vector<1x1x1x128xf32>
      tpu.vector_store %arg7[%c0_19, %c0_20, %c0_21, %c0_22], %42 {strides = array<i32>} : memref<1x1x1x128xf32, #tpu.memory_space<vmem>>, vector<1x1x1x128xf32>,
    } else {
    }
    %c2_i32_9 = arith.constant 2 : i32
    %29 = arith.cmpi eq, %3, %c2_i32_9 : i32
    %30 = arith.extui %29 : i1 to i32
    %c0_i32_10 = arith.constant 0 : i32
    %31 = arith.cmpi ne, %30, %c0_i32_10 : i32
    scf.if %31 {
      %c0 = arith.constant 0 : index
      %c0_14 = arith.constant 0 : index
      %37 = vector.load %arg5[%c0, %c0_14] : memref<16x128xbf16, #tpu.memory_space<vmem>>, vector<16x128xbf16>
      %38 = arith.extf %37 : vector<16x128xbf16> to vector<16x128xf32>
      %39 = arith.mulf %38, %38 : vector<16x128xf32>
      %c0_15 = arith.constant 0 : index
      %c0_16 = arith.constant 0 : index
      %c0_17 = arith.constant 0 : index
      %c0_18 = arith.constant 0 : index
      %40 = vector.load %arg7[%c0_15, %c0_16, %c0_17, %c0_18] : memref<1x1x1x128xf32, #tpu.memory_space<vmem>>, vector<1x1x1x128xf32>
      %cst = arith.constant dense<0.000000e+00> : vector<128xf32>
      %41 = vector.multi_reduction <add>, %39, %cst [0] : vector<16x128xf32> to vector<128xf32>
      %42 = vector.shape_cast %41 : vector<128xf32> to vector<1x1x1x128xf32>
      %43 = arith.addf %40, %42 : vector<1x1x1x128xf32>
      %c0_19 = arith.constant 0 : index
      %c0_20 = arith.constant 0 : index
      %c0_21 = arith.constant 0 : index
      %c0_22 = arith.constant 0 : index
      %44 = vector.load %arg7[%c0_19, %c0_20, %c0_21, %c0_22] : memref<1x1x1x128xf32, #tpu.memory_space<vmem>>, vector<1x1x1x128xf32>
      tpu.vector_store %arg7[%c0_19, %c0_20, %c0_21, %c0_22], %43 {strides = array<i32>} : memref<1x1x1x128xf32, #tpu.memory_space<vmem>>, vector<1x1x1x128xf32>,
    } else {
    }
    %c3_i32_11 = arith.constant 3 : i32
    %32 = arith.cmpi eq, %3, %c3_i32_11 : i32
    %33 = arith.extui %32 : i1 to i32
    %c0_i32_12 = arith.constant 0 : i32
    %34 = arith.cmpi ne, %33, %c0_i32_12 : i32
    scf.if %34 {
      %c0 = arith.constant 0 : index
      %c0_14 = arith.constant 0 : index
      %37 = vector.load %arg6[%c0, %c0_14] : memref<8x128xf32, #tpu.memory_space<vmem>>, vector<8x128xf32>
      %38 = arith.mulf %37, %37 : vector<8x128xf32>
      %c0_15 = arith.constant 0 : index
      %c0_16 = arith.constant 0 : index
      %c0_17 = arith.constant 0 : index
      %c0_18 = arith.constant 0 : index
      %39 = vector.load %arg7[%c0_15, %c0_16, %c0_17, %c0_18] : memref<1x1x1x128xf32, #tpu.memory_space<vmem>>, vector<1x1x1x128xf32>
      %cst = arith.constant dense<0.000000e+00> : vector<128xf32>
      %40 = vector.multi_reduction <add>, %38, %cst [0] : vector<8x128xf32> to vector<128xf32>
      %41 = vector.shape_cast %40 : vector<128xf32> to vector<1x1x1x128xf32>
      %42 = arith.addf %39, %41 : vector<1x1x1x128xf32>
      %c0_19 = arith.constant 0 : index
      %c0_20 = arith.constant 0 : index
      %c0_21 = arith.constant 0 : index
      %c0_22 = arith.constant 0 : index
      %43 = vector.load %arg7[%c0_19, %c0_20, %c0_21, %c0_22] : memref<1x1x1x128xf32, #tpu.memory_space<vmem>>, vector<1x1x1x128xf32>
      tpu.vector_store %arg7[%c0_19, %c0_20, %c0_21, %c0_22], %42 {strides = array<i32>} : memref<1x1x1x128xf32, #tpu.memory_space<vmem>>, vector<1x1x1x128xf32>,
    } else {
    }
    %35 = arith.extui %20 : i1 to i32
    %c0_i32_13 = arith.constant 0 : i32
    %36 = arith.cmpi ne, %35, %c0_i32_13 : i32
    scf.if %36 {
      %c0 = arith.constant 0 : index
      %c0_14 = arith.constant 0 : index
      %c0_15 = arith.constant 0 : index
      %c0_16 = arith.constant 0 : index
      %37 = vector.load %arg7[%c0, %c0_14, %c0_15, %c0_16] : memref<1x1x1x128xf32, #tpu.memory_space<vmem>>, vector<1x1x1x128xf32>
      %cst = arith.constant dense<0.000000e+00> : vector<1x1x1xf32>
      %38 = vector.multi_reduction <add>, %37, %cst [3] : vector<1x1x1x128xf32> to vector<1x1x1xf32>
      %39 = vector.shape_cast %38 : vector<1x1x1xf32> to vector<1x1x1x1xf32>
      %40 = vector.shape_cast %39 : vector<1x1x1x1xf32> to vector<1x1x1x1xf32>
      %41 = vector.broadcast %40 : vector<1x1x1x1xf32> to vector<1x1x1x128xf32>
      %c0_17 = arith.constant 0 : index
      %c0_18 = arith.constant 0 : index
      %c0_19 = arith.constant 0 : index
      %c0_20 = arith.constant 0 : index
      %42 = vector.load %arg7[%c0_17, %c0_18, %c0_19, %c0_20] : memref<1x1x1x128xf32, #tpu.memory_space<vmem>>, vector<1x1x1x128xf32>
      tpu.vector_store %arg7[%c0_17, %c0_18, %c0_19, %c0_20], %41 {strides = array<i32>} : memref<1x1x1x128xf32, #tpu.memory_space<vmem>>, vector<1x1x1x128xf32>,
    } else {
    }
    return
  }
  func.func @transform_0(%arg0: i32, %arg1: i32, %arg2: memref<4xi32, #tpu.memory_space<smem>>) -> (i32, i32) {
    %c2_i32 = arith.constant 2 : i32
    %0 = arith.muli %arg0, %c2_i32 : i32
    %1 = arith.addi %0, %arg1 : i32
    %c0_i32 = arith.constant 0 : i32
    %2 = arith.subi %1, %c0_i32 : i32
    %c0_i32_0 = arith.constant 0 : i32
    %c0_i32_1 = arith.constant 0 : i32
    %3 = arith.maxsi %c0_i32_0, %2 : i32
    %4 = arith.minsi %c0_i32_1, %3 : i32
    %c0_i32_2 = arith.constant 0 : i32
    %c0_i32_3 = arith.constant 0 : i32
    return %4, %c0_i32_2 : i32, i32
  }
  func.func @transform_1(%arg0: i32, %arg1: i32, %arg2: memref<4xi32, #tpu.memory_space<smem>>) -> (i32, i32) {
    %c2_i32 = arith.constant 2 : i32
    %0 = arith.muli %arg0, %c2_i32 : i32
    %1 = arith.addi %0, %arg1 : i32
    %c1_i32 = arith.constant 1 : i32
    %2 = arith.subi %1, %c1_i32 : i32
    %c0_i32 = arith.constant 0 : i32
    %c0_i32_0 = arith.constant 0 : i32
    %3 = arith.maxsi %c0_i32, %2 : i32
    %4 = arith.minsi %c0_i32_0, %3 : i32
    %c0_i32_1 = arith.constant 0 : i32
    %c0_i32_2 = arith.constant 0 : i32
    return %4, %c0_i32_1 : i32, i32
  }
  func.func @transform_2(%arg0: i32, %arg1: i32, %arg2: memref<4xi32, #tpu.memory_space<smem>>) -> (i32, i32) {
    %c2_i32 = arith.constant 2 : i32
    %0 = arith.muli %arg0, %c2_i32 : i32
    %1 = arith.addi %0, %arg1 : i32
    %c2_i32_0 = arith.constant 2 : i32
    %2 = arith.subi %1, %c2_i32_0 : i32
    %c0_i32 = arith.constant 0 : i32
    %c0_i32_1 = arith.constant 0 : i32
    %3 = arith.maxsi %c0_i32, %2 : i32
    %4 = arith.minsi %c0_i32_1, %3 : i32
    %c0_i32_2 = arith.constant 0 : i32
    %c0_i32_3 = arith.constant 0 : i32
    return %4, %c0_i32_2 : i32, i32
  }
  func.func @transform_3(%arg0: i32, %arg1: i32, %arg2: memref<4xi32, #tpu.memory_space<smem>>) -> (i32, i32) {
    %c2_i32 = arith.constant 2 : i32
    %0 = arith.muli %arg0, %c2_i32 : i32
    %1 = arith.addi %0, %arg1 : i32
    %c3_i32 = arith.constant 3 : i32
    %2 = arith.subi %1, %c3_i32 : i32
    %c0_i32 = arith.constant 0 : i32
    %c0_i32_0 = arith.constant 0 : i32
    %3 = arith.maxsi %c0_i32, %2 : i32
    %4 = arith.minsi %c0_i32_0, %3 : i32
    %c0_i32_1 = arith.constant 0 : i32
    %c0_i32_2 = arith.constant 0 : i32
    return %4, %c0_i32_1 : i32, i32
  }
  func.func @transform_4(%arg0: i32, %arg1: i32, %arg2: memref<4xi32, #tpu.memory_space<smem>>) -> (i32, i32, i32, i32) {
    %c2_i32 = arith.constant 2 : i32
    %0 = arith.muli %arg0, %c2_i32 : i32
    %1 = arith.addi %0, %arg1 : i32
    %2 = arith.index_cast %1 : i32 to index
    %3 = memref.load %arg2[%2] : memref<4xi32, #tpu.memory_space<smem>>
    %c0_i32 = arith.constant 0 : i32
    %c3_i32 = arith.constant 3 : i32
    %4 = arith.maxsi %c0_i32, %3 : i32
    %5 = arith.minsi %c3_i32, %4 : i32
    %c0_i32_0 = arith.constant 0 : i32
    %c0_i32_1 = arith.constant 0 : i32
    %c0_i32_2 = arith.constant 0 : i32
    return %arg0, %5, %c0_i32_0, %c0_i32_1 : i32, i32, i32, i32
  }
}

</mosaic_0001>

<bundles_post_ra>
// kernel: _reg_loss_jit.1
= control target key start
LH: loop header
LB: loop body
LE: loop exit
PB: predicated region body
PF: predicated region fallthrough
CT: control target
= control target key end

     0   :  { %s971_s21 = smov [#allocation3]   ;;  %s1108_s0 = inlined_call_operand.vmem [shape: s32[4], index: 0, kind: input, shape index: {}]   ;;  %s1109_s1 = inlined_call_operand.vmem [shape: f32[8,128], index: 1, kind: input, shape index: {}]   ;;  %s1110_s2 = inlined_call_operand.vmem [shape: f32[32,128], index: 2, kind: input, shape index: {}]   ;;  %s1111_s3 = inlined_call_operand.vmem [shape: bf16[16,128], index: 3, kind: input, shape index: {}]   ;;  %s1112_s4 = inlined_call_operand.vmem [shape: f32[8,128], index: 4, kind: input, shape index: {}]   ;;  %s1113_s5 = inlined_call_operand.vmem [shape: f32[2,4,1,128], index: 5, kind: output, shape index: {}]  }
   0x1   :  { %s11_s20 = sshll.u32 %s1108_s0, 4  ;;  %s12_s20 = int_to_ptr.vmem [resolvable:$true] %s11_s20 }
   0x2   :  { %14 = dma.vmem_to_smem %s12_s20, 16, %s971_s21, [#allocation2] }
   0x3   :  { %949 = dma.done.wait [#allocation2], 16 }
   0x4   :  { %950 = vsyncadd [#allocation2], 4294967280 }
   0x5   :  { %17 = sfence }
   0x6   :  { %s1006_s22 = smov 0   ;;  %s1008_s23 = smov 0  }
   0x7   :  { %s1010_s24 = smov 0   ;;  %s1012_s25 = smov 0  }
   0x8   :  { %s1014_s26 = smov 0  }
   0x9 LB: > { %s32_s0 = sadd.s32 1, %s961_s24  ;;  %s35_s27 = sadd.s32 1, %s965_s25  ;;  %s969_s26 = sphi %s1014_s26, %s23_s26   ;;  %s965_s25 = sphi %s1012_s25, %s1118_s25   ;;  %s961_s24 = sphi %s1010_s24, %s1117_s24   ;;  %s957_s23 = sphi %s1008_s23, %s1116_s23   ;;  %s953_s22 = sphi %s1006_s22, %s1115_s22  }
   0xa   : > { %p33_p0 = scmp.ge.s32.totalorder %s32_s0, 2  ;;  %p816_p1 = scmp.ge.s32.totalorder %s969_s26, 1 }
   0xb   : > { %p337_p2 = scmp.lt.s32.totalorder %s969_s26, 5 }
   0xc   : > { %s1120_s0 = smov (%p33_p0, %s32_s0), 0  ;;  %s1122_s27 = smov (!%p33_p0, %s35_s27), %s965_s25 }
   0xd   : > { %p338_p3 = pnand %p816_p1, %p337_p2  ;;  %p37_p4 = scmp.ge.s32.totalorder %s1122_s27, 2 }
   0xe   : > { %s850_s28 = sshll.u32 (!%p338_p3), %s957_s23, 1  ;;  %p493_p5 = scmp.lt.s32.totalorder (!%p338_p3), %s957_s23, 1 }
   0xf   : > { %s1124_s27 = smov (%p37_p4, %s1122_s27), 0  ;;  %341 = sbr.rel (%p338_p3) target bundleno = 275 (0x113), region = 36 }
  0x10   : > { %s487_s29 = sadd.s32 (!%p338_p3), %s953_s22, %s850_s28  ;;  %p519_p10 = scmp.eq.s32.totalorder (!%p338_p3), %s953_s22, 0 }
  0x11   : > { %s488_s30 = sld [smem:[#allocation3 + %s487_s29]] (!%p338_p3)  ;;  %s858_s6 = sadd.s32 (!%p338_p3), 4294967295, %s487_s29 }
  0x12   : > { %p511_p6 = scmp.gt.s32.totalorder (!%p338_p3), %s858_s6, 0  ;;  %s514_s7 = sadd.s32 (!%p338_p3), 1, %s487_s29 }
  0x13   : > { %s1039_s8 = sld [smem:[#allocation3 + %s487_s29]] (!%p338_p3)  ;;  %p515_p7 = scmp.lt.s32.totalorder (!%p338_p3), %s514_s7, 3 }
  0x14   : > { %s1126_s23 = smov (!%p493_p5, %s957_s23), 1  ;;  %s1128_s6 = smov (!%p511_p6, %s858_s6), 0 }
  0x15   : > { %s513_s9 = sld [smem:[#allocation3 + %s1128_s6]]  ;;  %s1132_s7 = smov (!%p515_p7, %s514_s7), 3 }
  0x16   : > { %s517_s10 = sld [smem:[#allocation3 + %s1132_s7]]  ;;  %s856_s11 = sshll.u32 %s1126_s23, 2 }
  0x17   : > { %p489_p8 = scmp.gt.s32.totalorder %s488_s30, 0  ;;  %p851_p9 = scmp.lt.s32.totalorder %s488_s30, 3 }
  0x18   : > { %p524_p1 = scmp.eq.s32.totalorder %s953_s22, 1 }
  0x19   : > { %s1130_s30 = smov (!%p489_p8, %s488_s30), 0  ;;  %p518_p12 = scmp.ge.s32.totalorder %s1039_s8, 0 }
  0x1a   : > { %s1134_s30 = smov (!%p851_p9, %s1130_s30), 3 }
  0x1b   : > { %p495_p11 = scmp.lt.s32.totalorder %s1134_s30, 3  ;;  %p520_p13 = scmp.ne.s32.totalorder %s513_s9, %s1039_s8 }
  0x1c   : > { %p525_p3 = scmp.ne.s32.totalorder %s517_s10, %s1039_s8 }
  0x1d   : > { %s1136_s30 = smov (!%p495_p11, %s1134_s30), 3  ;;  %p521_p0 = por %p520_p13, %p519_p10 }
  0x1e   : > { %s498_s12 = sadd.s32 %s856_s11, %s1136_s30  ;;  %p526_p4 = por %p525_p3, %p524_p1 }
  0x1f   : > { %s1048_s15 = scalar_lea.vmem %s1113_s5, %s498_s12  ;;  %p522_p2 = pnand %p521_p0, %p518_p12 }
  0x20   : > { %p1051_p5 = pnand %p526_p4, %p518_p12 }
  0x21   : > { %530 = sbr.rel (%p522_p2) target bundleno = 40 (0x28), region = 40 }
  0x26   : > { %v972_v0 = vmov 0.0  }
  0x27   : > { %531 = vst [vmem:[%s1048_s15] sm:$0x1] %v972_v0 }
  0x28 PF: > { %p859_p6 = scmp.ne.s32.totalorder %s1039_s8, 0 }
  0x2a   : > { %535 = sbr.rel (%p859_p6) target bundleno = 65 (0x41), region = 44 }
  0x2f   : > { %v536_v1 = vld [vmem:[%s1109_s1] sm:$0xff] }
  0x30   : > { %v537_v2 = vmul.f32 %v536_v1, %v536_v1  ;;  %v538_v8 = vld [vmem:[%s1048_s15] sm:$0x1] }
  0x32   : > { %v539_v3 = vrot.slane %v537_v2, 4 }
  0x34   : > { %v540_v4 = vadd.f32 %v539_v3, %v537_v2 }
  0x36   : > { %v541_v5 = vrot.slane %v540_v4, 2 }
  0x38   : > { %v542_v6 = vadd.f32 %v541_v5, %v540_v4 }
  0x3a   : > { %v543_v7 = vrot.slane %v542_v6, 1 }
  0x3c   : > { %v544_v9 = vadd.f32 %v543_v7, %v542_v6 }
  0x3e   : > { %v545_v10 = vadd.f32 %v544_v9, %v538_v8 }
  0x40   : > { %546 = vst [vmem:[%s1048_s15] sm:$0x1] %v545_v10 }
  0x41 PF: > { %p860_p7 = scmp.ne.s32.totalorder %s1039_s8, 1 }
  0x43   : > { %550 = sbr.rel (%p860_p7) target bundleno = 96 (0x60), region = 48 }
  0x48   : > { %v551_v11 = vld [vmem:[%s1110_s2] sm:$0xff]  ;;  %v552_v12 = vld [vmem:[%s1110_s2 + $0x8] sm:$0xff]  ;;  %v553_v13 = vld [vmem:[%s1110_s2 + $0x10] sm:$0xff] }
  0x49   : > { %v554_v14 = vld [vmem:[%s1110_s2 + $0x18] sm:$0xff]  ;;  %v555_v15 = vmul.f32 %v551_v11, %v551_v11  ;;  %v556_v16 = vmul.f32 %v552_v12, %v552_v12  ;;  %v557_v17 = vmul.f32 %v553_v13, %v553_v13  ;;  %v559_v27 = vld [vmem:[%s1048_s15] sm:$0x1] }
  0x4a   : > { %v558_v18 = vmul.f32 %v554_v14, %v554_v14 }
  0x4b   : > { %v560_v19 = vadd.f32 %v556_v16, %v555_v15 }
  0x4d   : > { %v561_v20 = vadd.f32 %v560_v19, %v557_v17 }
  0x4f   : > { %v562_v21 = vadd.f32 %v561_v20, %v558_v18 }
  0x51   : > { %v563_v22 = vrot.slane %v562_v21, 4 }
  0x53   : > { %v564_v23 = vadd.f32 %v563_v22, %v562_v21 }
  0x55   : > { %v565_v24 = vrot.slane %v564_v23, 2 }
  0x57   : > { %v566_v25 = vadd.f32 %v565_v24, %v564_v23 }
  0x59   : > { %v567_v26 = vrot.slane %v566_v25, 1 }
  0x5b   : > { %v568_v28 = vadd.f32 %v567_v26, %v566_v25 }
  0x5d   : > { %v569_v29 = vadd.f32 %v568_v28, %v559_v27 }
  0x5f   : > { %570 = vst [vmem:[%s1048_s15] sm:$0x1] %v569_v29 }
  0x60 PF: > { %p861_p8 = scmp.ne.s32.totalorder %s1039_s8, 2 }
  0x62   : > { %574 = sbr.rel (%p861_p8) target bundleno = 125 (0x7d), region = 52 }
  0x67   : > { %v872_v30 = vld [vmem:[%s1111_s3] sm:$0xff]  }
  0x68   : > { %v873_v31 = vunpack.c.l.bf16 %v872_v30  ;;  %v874_v32 = vunpack.c.h.bf16 %v872_v30  ;;  %v581_v41 = vld [vmem:[%s1048_s15] sm:$0x1] }
  0x6a   : > { %v579_v33 = vmul.f32 %v873_v31, %v873_v31  ;;  %v580_v34 = vmul.f32 %v874_v32, %v874_v32 }
  0x6c   : > { %v582_v35 = vadd.f32 %v580_v34, %v579_v33 }
  0x6e   : > { %v583_v36 = vrot.slane %v582_v35, 4 }
  0x70   : > { %v584_v37 = vadd.f32 %v583_v36, %v582_v35 }
  0x72   : > { %v585_v38 = vrot.slane %v584_v37, 2 }
  0x74   : > { %v586_v39 = vadd.f32 %v585_v38, %v584_v37 }
  0x76   : > { %v587_v40 = vrot.slane %v586_v39, 1 }
  0x78   : > { %v588_v42 = vadd.f32 %v587_v40, %v586_v39 }
  0x7a   : > { %v589_v43 = vadd.f32 %v588_v42, %v581_v41 }
  0x7c   : > { %590 = vst [vmem:[%s1048_s15] sm:$0x1] %v589_v43 }
  0x7d PF: > { %p862_p9 = scmp.ne.s32.totalorder %s1039_s8, 3 }
  0x7f   : > { %594 = sbr.rel (%p862_p9) target bundleno = 150 (0x96), region = 56 }
  0x84   : > { %v595_v44 = vld [vmem:[%s1112_s4] sm:$0xff] }
  0x85   : > { %v596_v45 = vmul.f32 %v595_v44, %v595_v44  ;;  %v597_v51 = vld [vmem:[%s1048_s15] sm:$0x1] }
  0x87   : > { %v598_v46 = vrot.slane %v596_v45, 4 }
  0x89   : > { %v599_v47 = vadd.f32 %v598_v46, %v596_v45 }
  0x8b   : > { %v600_v48 = vrot.slane %v599_v47, 2 }
  0x8d   : > { %v601_v49 = vadd.f32 %v600_v48, %v599_v47 }
  0x8f   : > { %v602_v50 = vrot.slane %v601_v49, 1 }
  0x91   : > { %v603_v52 = vadd.f32 %v602_v50, %v601_v49 }
  0x93   : > { %v604_v53 = vadd.f32 %v603_v52, %v597_v51 }
  0x95   : > { %605 = vst [vmem:[%s1048_s15] sm:$0x1] %v604_v53 }
  0x96 PF: > { %607 = sbr.rel (%p1051_p5) target bundleno = 275 (0x113), region = 60 }
  0x9b   : > { %vm609_vm0 = vcmask 1040384  }
  0x9c   : > { %v608_v54 = vld [vmem:[%s1048_s15] sm:$0x1] }
  0x9d   : > { %v610_v55 = vsel %vm609_vm0, %v608_v54, 0.0 }
  0x9e   : > { %611 = vadd.xlane.f32.xlu0 %v610_v55 }
 0x111   : > { %v612_v56 = vpop.xlane.xlu0 %611 }
 0x112   : > { %613 = vst [vmem:[%s1048_s15] sm:$0x1] %v612_v56 }
 0x113 PF: > { %s23_s26 = sadd.s32 1, %s969_s26   ;;  %s1115_s22 = smov %s961_s24 }
 0x114   : > { %p20_p10 = scmp.ge.s32.totalorder %s23_s26, 6   ;;  %s1116_s23 = smov %s965_s25 }
 0x115   : > { %s1117_s24 = smov %s1120_s0  ;;  %s1118_s25 = smov %s1124_s27 }
 0x116   :  { %22 = sbr.rel (!%p20_p10) target bundleno = 9 (0x9), region = 99 }

</bundles_post_ra>
